<compile_context>
chip_gen: v7x
topology: tpu7x:2x2x1
jax: 0.10.0
libtpu: 0.0.40
codegen_flags: <defaults>
</compile_context>

<pallas_src>
import functools

import jax
import jax.numpy as jnp
from jax.experimental import pallas as pl
from jax.experimental.pallas import tpu as pltpu

NEG_SLOPE = 0.01          # nn.LeakyReLU default
NEG_PAD = -1e30           # padded logits -> exp() underflows to exactly 0
LANE = 128


def _leaky_relu(x):
    return jnp.where(x > 0, x, NEG_SLOPE * x)


def _round_up(n, m):
    return ((n + m - 1) // m) * m


def classifier_kernel(x_ref, w1_ref, b1_ref, w2_ref, b2_ref, w3_ref, b3_ref, o_ref):
    # x_ref: (TILE_B, D) bf16;  weights bf16;  biases f32;  o_ref: (TILE_B, CLS_PAD) f32
    x = x_ref[...]

    # fc1 + LeakyReLU (MXU bf16 inputs, f32 accumulate, f32 elementwise)
    h1 = jnp.dot(x, w1_ref[...], preferred_element_type=jnp.float32) + b1_ref[...]
    h1 = _leaky_relu(h1)

    # fc2 + LeakyReLU
    h2 = jnp.dot(h1.astype(jnp.bfloat16), w2_ref[...],
                 preferred_element_type=jnp.float32) + b2_ref[...]
    h2 = _leaky_relu(h2)

    # fc3 (logits over the 128-padded class axis; pad columns -> -1e30)
    logits = jnp.dot(h2.astype(jnp.bfloat16), w3_ref[...],
                     preferred_element_type=jnp.float32) + b3_ref[...]

    # Numerically stable softmax over the (lane-dense) class axis.
    m = jnp.max(logits, axis=-1, keepdims=True)
    e = jnp.exp(logits - m)                       # padded lanes -> exp(-huge) == 0
    denom = jnp.sum(e, axis=-1, keepdims=True)
    o_ref[...] = (e * pl.reciprocal(denom, approx=True)).astype(o_ref.dtype)


@functools.partial(jax.jit, static_argnames=("tile_b",))
def classifier_forward(x, params, tile_b=None):
    """x: (B, input_size) float32. params: dict of f32 weights/biases (in,out layout)."""
    B, D = x.shape
    cls_num = params["w3"].shape[1]
    cls_pad = _round_up(max(cls_num, LANE), LANE)

    # Tile the batch: >=512 rows is the sweet spot for large B; for small B just
    # round up to the sublane multiple of 8 and run a single grid step.
    if tile_b is None:
        tile_b = 1024 if B >= 1024 else _round_up(B, 8)
    tile_b = min(tile_b, _round_up(B, 8))
    Bp = _round_up(B, tile_b)

    # bf16 ingestion for the MXU / HBM-read path; biases stay f32.
    x_bf = x.astype(jnp.bfloat16)
    if Bp != B:
        x_bf = jnp.pad(x_bf, ((0, Bp - B), (0, 0)))
    w1 = params["w1"].astype(jnp.bfloat16)
    w2 = params["w2"].astype(jnp.bfloat16)
    b1 = params["b1"].astype(jnp.float32)
    b2 = params["b2"].astype(jnp.float32)

    # Lane-dense class axis: zero-pad w3 columns, bias pad = -1e30.
    w3 = jnp.zeros((params["w3"].shape[0], cls_pad), jnp.bfloat16)
    w3 = w3.at[:, :cls_num].set(params["w3"].astype(jnp.bfloat16))
    b3 = jnp.full((1, cls_pad), NEG_PAD, jnp.float32)
    b3 = b3.at[:, :cls_num].set(params["b3"].astype(jnp.float32))

    grid = (Bp // tile_b,)

    def const(arr):
        return pl.BlockSpec(arr.shape, lambda i: tuple(0 for _ in arr.shape))

    flops = 2 * Bp * (D * w1.shape[1] + w1.shape[1] * w2.shape[1]
                      + w2.shape[1] * cls_pad)
    bytes_accessed = (x_bf.size * 2 + Bp * cls_pad * 4
                      + w1.size * 2 + w2.size * 2 + w3.size * 2
                      + (b1.size + b2.size + b3.size) * 4)

    out_padded = pl.pallas_call(
        classifier_kernel,
        out_shape=jax.ShapeDtypeStruct((Bp, cls_pad), jnp.float32),
        grid=grid,
        in_specs=[
            pl.BlockSpec((tile_b, D), lambda i: (i, 0)),   # x: batch-tiled
            const(w1), const(b1), const(w2), const(b2), const(w3), const(b3),
        ],
        out_specs=pl.BlockSpec((tile_b, cls_pad), lambda i: (i, 0)),
        compiler_params=pltpu.CompilerParams(
            dimension_semantics=("parallel",),
            vmem_limit_bytes=32 * 1024 * 1024,
        ),
        cost_estimate=pl.CostEstimate(
            flops=flops,
            transcendentals=Bp * (cls_pad + 1),
            bytes_accessed=bytes_accessed,
        ),
    )(x_bf, w1, b1, w2, b2, w3, b3)

    return out_padded[:B, :cls_num]


def init_params(key, input_size=64, cls_num=3):
    """Uniform init like PyTorch's default Linear init; weights stored (in, out)."""
    def linear(key, fan_in, fan_out):
        kw, kb = jax.random.split(key)
        bound = 1.0 / jnp.sqrt(fan_in)
        w = jax.random.uniform(kw, (fan_in, fan_out), jnp.float32, -bound, bound)
        b = jax.random.uniform(kb, (1, fan_out), jnp.float32, -bound, bound)
        return w, b

    k1, k2, k3 = jax.random.split(key, 3)
    w1, b1 = linear(k1, input_size, 64)
    w2, b2 = linear(k2, 64, 16)
    w3, b3 = linear(k3, 16, cls_num)
    return dict(w1=w1, b1=b1, w2=w2, b2=b2, w3=w3, b3=b3)


def reference_forward_f32(x, params):
    """Pure f32 reference (matches the PyTorch module in f32)."""
    h1 = _leaky_relu(x @ params["w1"] + params["b1"])
    h2 = _leaky_relu(h1 @ params["w2"] + params["b2"])
    logits = h2 @ params["w3"] + params["b3"]
    return jax.nn.softmax(logits, axis=1)


def reference_forward_bf16(x, params):
    """Reference that mimics the kernel's bf16 MXU inputs / f32 accumulation."""
    def dot(a, w):
        return jnp.dot(a.astype(jnp.bfloat16), w.astype(jnp.bfloat16),
                       preferred_element_type=jnp.float32)
    h1 = _leaky_relu(dot(x, params["w1"]) + params["b1"])
    h2 = _leaky_relu(dot(h1, params["w2"]) + params["b2"])
    logits = dot(h2, params["w3"]) + params["b3"]
    return jax.nn.softmax(logits, axis=1)


if __name__ == "__main__":
    key = jax.random.PRNGKey(0)
    kx, kp = jax.random.split(key)

    B, input_size, cls_num = 8, 64, 3
    x = jax.random.normal(kx, (B, input_size), jnp.float32)
    params = init_params(kp, input_size=input_size, cls_num=cls_num)

    out = jax.block_until_ready(classifier_forward(x, params))

    ref_bf16 = reference_forward_bf16(x, params)   # same numerics as the kernel
    ref_f32 = reference_forward_f32(x, params)     # module semantics in f32

    assert out.shape == (B, cls_num), f"bad shape {out.shape}"
    assert jnp.allclose(out, ref_bf16, atol=5e-3, rtol=5e-3), "mismatch vs bf16 reference"
    assert jnp.allclose(out, ref_f32, atol=3e-2), "mismatch vs f32 reference"
    assert jnp.allclose(jnp.sum(out, axis=1), 1.0, atol=5e-3), "softmax rows must sum to 1"

    print("KERNEL_OK")
</pallas_src>

<mosaic_0001>
module attributes {stable_mosaic.version = 11 : i64} {
  func.func @classifier_kernel(%arg0: i32, %arg1: memref<8x64xbf16, #tpu.memory_space<vmem>>, %arg2: memref<64x64xbf16, #tpu.memory_space<vmem>>, %arg3: memref<1x64xf32, #tpu.memory_space<vmem>>, %arg4: memref<64x16xbf16, #tpu.memory_space<vmem>>, %arg5: memref<1x16xf32, #tpu.memory_space<vmem>>, %arg6: memref<16x128xbf16, #tpu.memory_space<vmem>>, %arg7: memref<1x128xf32, #tpu.memory_space<vmem>>, %arg8: memref<8x128xf32, #tpu.memory_space<vmem>>) attributes {dimension_semantics = [#tpu.dimension_semantics<parallel>], iteration_bounds = array<i64: 1>, scalar_prefetch = 0 : i64, scratch_operands = 0 : i64, tpu.core_type = #tpu.core_type<tc>, window_params = [{transform_indices = @transform_0, window_bounds = array<i64: 8, 64>}, {pipeline_mode = #tpu.pipeline_mode<synchronous>, transform_indices = @transform_1, window_bounds = array<i64: 64, 64>}, {pipeline_mode = #tpu.pipeline_mode<synchronous>, transform_indices = @transform_2, window_bounds = array<i64: 1, 64>}, {pipeline_mode = #tpu.pipeline_mode<synchronous>, transform_indices = @transform_3, window_bounds = array<i64: 64, 16>}, {pipeline_mode = #tpu.pipeline_mode<synchronous>, transform_indices = @transform_4, window_bounds = array<i64: 1, 16>}, {pipeline_mode = #tpu.pipeline_mode<synchronous>, transform_indices = @transform_5, window_bounds = array<i64: 16, 128>}, {pipeline_mode = #tpu.pipeline_mode<synchronous>, transform_indices = @transform_6, window_bounds = array<i64: 1, 128>}, {transform_indices = @transform_7, window_bounds = array<i64: 8, 128>}]} {
    %c0 = arith.constant 0 : index
    %c0_0 = arith.constant 0 : index
    %0 = vector.load %arg1[%c0, %c0_0] : memref<8x64xbf16, #tpu.memory_space<vmem>>, vector<8x64xbf16>
    %c0_1 = arith.constant 0 : index
    %c0_2 = arith.constant 0 : index
    %1 = vector.load %arg2[%c0_1, %c0_2] : memref<64x64xbf16, #tpu.memory_space<vmem>>, vector<64x64xbf16>
    %cst = arith.constant dense<0.000000e+00> : vector<8x64xf32>
    %2 = tpu.matmul %0, %1, %cst {dimension_numbers = #tpu.dot_dimension_numbers<[1], [0], [0], [1], [0, 0, 1, 1], [], []>} : vector<8x64xbf16>, vector<64x64xbf16>, vector<8x64xf32> -> vector<8x64xf32>
    %c0_3 = arith.constant 0 : index
    %c0_4 = arith.constant 0 : index
    %3 = vector.load %arg3[%c0_3, %c0_4] : memref<1x64xf32, #tpu.memory_space<vmem>>, vector<1x64xf32>
    %4 = vector.broadcast %3 : vector<1x64xf32> to vector<8x64xf32>
    %5 = arith.addf %2, %4 : vector<8x64xf32>
    %cst_5 = arith.constant 0.000000e+00 : f32
    %6 = vector.broadcast %cst_5 : f32 to vector<8x64xf32>
    %7 = arith.cmpf ogt, %5, %6 : vector<8x64xf32>
    %cst_6 = arith.constant 0.00999999977 : f32
    %8 = vector.broadcast %cst_6 : f32 to vector<8x64xf32>
    %9 = arith.mulf %8, %5 : vector<8x64xf32>
    %10 = arith.select %7, %5, %9 : vector<8x64xi1>, vector<8x64xf32>
    %11 = arith.truncf %10 : vector<8x64xf32> to vector<8x64xbf16>
    %c0_7 = arith.constant 0 : index
    %c0_8 = arith.constant 0 : index
    %12 = vector.load %arg4[%c0_7, %c0_8] : memref<64x16xbf16, #tpu.memory_space<vmem>>, vector<64x16xbf16>
    %cst_9 = arith.constant dense<0.000000e+00> : vector<8x16xf32>
    %13 = tpu.matmul %11, %12, %cst_9 {dimension_numbers = #tpu.dot_dimension_numbers<[1], [0], [0], [1], [0, 0, 1, 1], [], []>} : vector<8x64xbf16>, vector<64x16xbf16>, vector<8x16xf32> -> vector<8x16xf32>
    %c0_10 = arith.constant 0 : index
    %c0_11 = arith.constant 0 : index
    %14 = vector.load %arg5[%c0_10, %c0_11] : memref<1x16xf32, #tpu.memory_space<vmem>>, vector<1x16xf32>
    %15 = vector.broadcast %14 : vector<1x16xf32> to vector<8x16xf32>
    %16 = arith.addf %13, %15 : vector<8x16xf32>
    %cst_12 = arith.constant 0.000000e+00 : f32
    %17 = vector.broadcast %cst_12 : f32 to vector<8x16xf32>
    %18 = arith.cmpf ogt, %16, %17 : vector<8x16xf32>
    %cst_13 = arith.constant 0.00999999977 : f32
    %19 = vector.broadcast %cst_13 : f32 to vector<8x16xf32>
    %20 = arith.mulf %19, %16 : vector<8x16xf32>
    %21 = arith.select %18, %16, %20 : vector<8x16xi1>, vector<8x16xf32>
    %22 = arith.truncf %21 : vector<8x16xf32> to vector<8x16xbf16>
    %c0_14 = arith.constant 0 : index
    %c0_15 = arith.constant 0 : index
    %23 = vector.load %arg6[%c0_14, %c0_15] : memref<16x128xbf16, #tpu.memory_space<vmem>>, vector<16x128xbf16>
    %cst_16 = arith.constant dense<0.000000e+00> : vector<8x128xf32>
    %24 = tpu.matmul %22, %23, %cst_16 {dimension_numbers = #tpu.dot_dimension_numbers<[1], [0], [0], [1], [0, 0, 1, 1], [], []>} : vector<8x16xbf16>, vector<16x128xbf16>, vector<8x128xf32> -> vector<8x128xf32>
    %c0_17 = arith.constant 0 : index
    %c0_18 = arith.constant 0 : index
    %25 = vector.load %arg7[%c0_17, %c0_18] : memref<1x128xf32, #tpu.memory_space<vmem>>, vector<1x128xf32>
    %26 = vector.broadcast %25 : vector<1x128xf32> to vector<8x128xf32>
    %27 = arith.addf %24, %26 : vector<8x128xf32>
    %cst_19 = arith.constant dense<0xFF800000> : vector<8xf32>
    %28 = vector.multi_reduction <maximumf>, %27, %cst_19 [1] : vector<8x128xf32> to vector<8xf32>
    %29 = vector.shape_cast %28 : vector<8xf32> to vector<8x1xf32>
    %30 = vector.broadcast %29 : vector<8x1xf32> to vector<8x128xf32>
    %31 = arith.subf %27, %30 : vector<8x128xf32>
    %32 = math.exp %31 : vector<8x128xf32>
    %cst_20 = arith.constant dense<0.000000e+00> : vector<8xf32>
    %33 = vector.multi_reduction <add>, %32, %cst_20 [1] : vector<8x128xf32> to vector<8xf32>
    %34 = vector.shape_cast %33 : vector<8xf32> to vector<8x1xf32>
    %35 = tpu.reciprocal %34 {approx = true} : vector<8x1xf32> -> vector<8x1xf32>
    %36 = vector.broadcast %35 : vector<8x1xf32> to vector<8x128xf32>
    %37 = arith.mulf %32, %36 : vector<8x128xf32>
    %c0_21 = arith.constant 0 : index
    %c0_22 = arith.constant 0 : index
    %38 = vector.load %arg8[%c0_21, %c0_22] : memref<8x128xf32, #tpu.memory_space<vmem>>, vector<8x128xf32>
    tpu.vector_store %arg8[%c0_21, %c0_22], %37 {strides = array<i32>} : memref<8x128xf32, #tpu.memory_space<vmem>>, vector<8x128xf32>,
    return
  }
  func.func @transform_0(%arg0: i32) -> (i32, i32) {
    %c0_i32 = arith.constant 0 : i32
    %c0_i32_0 = arith.constant 0 : i32
    return %arg0, %c0_i32 : i32, i32
  }
  func.func @transform_1(%arg0: i32) -> (i32, i32) {
    %c0_i32 = arith.constant 0 : i32
    %c0_i32_0 = arith.constant 0 : i32
    %c0_i32_1 = arith.constant 0 : i32
    return %c0_i32, %c0_i32_0 : i32, i32
  }
  func.func @transform_2(%arg0: i32) -> (i32, i32) {
    %c0_i32 = arith.constant 0 : i32
    %c0_i32_0 = arith.constant 0 : i32
    %c0_i32_1 = arith.constant 0 : i32
    return %c0_i32, %c0_i32_0 : i32, i32
  }
  func.func @transform_3(%arg0: i32) -> (i32, i32) {
    %c0_i32 = arith.constant 0 : i32
    %c0_i32_0 = arith.constant 0 : i32
    %c0_i32_1 = arith.constant 0 : i32
    return %c0_i32, %c0_i32_0 : i32, i32
  }
  func.func @transform_4(%arg0: i32) -> (i32, i32) {
    %c0_i32 = arith.constant 0 : i32
    %c0_i32_0 = arith.constant 0 : i32
    %c0_i32_1 = arith.constant 0 : i32
    return %c0_i32, %c0_i32_0 : i32, i32
  }
  func.func @transform_5(%arg0: i32) -> (i32, i32) {
    %c0_i32 = arith.constant 0 : i32
    %c0_i32_0 = arith.constant 0 : i32
    %c0_i32_1 = arith.constant 0 : i32
    return %c0_i32, %c0_i32_0 : i32, i32
  }
  func.func @transform_6(%arg0: i32) -> (i32, i32) {
    %c0_i32 = arith.constant 0 : i32
    %c0_i32_0 = arith.constant 0 : i32
    %c0_i32_1 = arith.constant 0 : i32
    return %c0_i32, %c0_i32_0 : i32, i32
  }
  func.func @transform_7(%arg0: i32) -> (i32, i32) {
    %c0_i32 = arith.constant 0 : i32
    %c0_i32_0 = arith.constant 0 : i32
    return %arg0, %c0_i32 : i32, i32
  }
}

</mosaic_0001>

<bundles_post_ra>
// kernel: classifier_forward.1
= control target key start
LH: loop header
LB: loop body
LE: loop exit
PB: predicated region body
PF: predicated region fallthrough
CT: control target
= control target key end

     0   :  { %v346_v0 = vmov 0.0   ;;  %vm347_vm0 = vmmov 0   ;;  %vm67_vm1 = vcmask 523264   ;;  %vm216_vm4 = vcmask 130048   ;;  %s435_s1 = inlined_call_operand.vmem [shape: bf16[64,64], index: 1, kind: input, shape index: {}]   ;;  %s436_s3 = inlined_call_operand.vmem [shape: bf16[64,16], index: 3, kind: input, shape index: {}]   ;;  %s437_s0 = inlined_call_operand.vmem [shape: bf16[8,64], index: 0, kind: input, shape index: {}]   ;;  %s438_s2 = inlined_call_operand.vmem [shape: f32[1,64], index: 2, kind: input, shape index: {}]   ;;  %s439_s5 = inlined_call_operand.vmem [shape: bf16[16,128], index: 5, kind: input, shape index: {}]   ;;  %s440_s4 = inlined_call_operand.vmem [shape: f32[1,16], index: 4, kind: input, shape index: {}]   ;;  %s441_s6 = inlined_call_operand.vmem [shape: f32[1,128], index: 6, kind: input, shape index: {}]   ;;  %s442_s7 = inlined_call_operand.vmem [shape: f32[8,128], index: 7, kind: output, shape index: {}]  }
   0x1   :  { %301 = vmatprep.subr.bf16.mxu0 %v346_v0  ;;  %v333_v1 = vld [vmem:[%s435_s1] sm:$0xff]   ;;  %309 = vmatprep.mubr.msk.bf16.mxu0 %vm347_vm0, %v346_v0  ;;  %v334_v2 = vld [vmem:[%s435_s1 + $0x8] sm:$0xff]   ;;  %v335_v4 = vld [vmem:[%s435_s1 + $0x10] sm:$0xff]  }
   0x2   :  { %313 = vmatprep.subr.bf16.mxu1 %v346_v0  ;;  %321 = vmatprep.mubr.msk.bf16.mxu1 %vm347_vm0, %v346_v0  ;;  %v337_v3 = vld [vmem:[%s436_s3] sm:$0xff]   ;;  %v338_v5 = vld [vmem:[%s436_s3 + $0x8] sm:$0xff]   ;;  %v336_v6 = vld [vmem:[%s435_s1 + $0x18] sm:$0xff]  }
   0x3   :  { %302 = vmatpush3.bf16.msra.mxu0 %v333_v1  ;;  %314 = vmatpush3.bf16.msra.mxu1 %v337_v3  ;;  %v27_v7 = vld [vmem:[%s437_s0] sm:$0xf]  ;;  %v339_v8 = vld [vmem:[%s436_s3 + $0x10] sm:$0xff]   ;;  %v340_v9 = vld [vmem:[%s436_s3 + $0x18] sm:$0xff]  }
   0x4   :  { %303 = vmatprep.subr.bf16.mxu0 %v346_v0  ;;  %315 = vmatprep.subr.bf16.mxu1 %v346_v0  ;;  %v274_v10 = vld [vmem:[%s438_s2] ss:$0 sm:$0xff] }
   0x5   :  { %v341_v19 = vld [vmem:[%s439_s5] sm:$0xff]  }
   0x6   :  { %v280_v20 = vld [vmem:[%s440_s4] ss:$0 sm:$0xff] }
   0x7   :  { %304 = vmatpush3.bf16.msra.mxu0 %v334_v2  ;;  %316 = vmatpush3.bf16.msra.mxu1 %v338_v5  ;;  %v286_v29 = vld [vmem:[%s441_s6] ss:$0 sm:$0xff] }
   0x8   :  { %305 = vmatprep.subr.bf16.mxu0 %v346_v0  ;;  %317 = vmatprep.subr.bf16.mxu1 %v346_v0 }
   0xb   :  { %306 = vmatpush3.bf16.msra.mxu0 %v335_v4  ;;  %318 = vmatpush3.bf16.msra.mxu1 %v339_v8 }
   0xc   :  { %307 = vmatprep.subr.bf16.mxu0 %v346_v0  ;;  %319 = vmatprep.subr.bf16.mxu1 %v346_v0 }
   0xf   :  { %308 = vmatpush3.bf16.msra.mxu0 %v336_v6  ;;  %320 = vmatpush3.bf16.msra.mxu1 %v340_v9 }
  0x10   :  { %325 = vmatprep.subr.bf16.mxu0 %v346_v0 }
  0x12   :  { %310 = vmatmul.mubr.msk.bf16.vlgmr.msra.gmra.mrb[0].mxu0 %vm67_vm1, %v27_v7 }
  0x13   :  { %327 = vmatprep.mubr.msk.bf16.mxu0 %vm347_vm0, %v346_v0  ;;  %326 = vmatpush3.bf16.msra.mxu0 %v341_v19 }
  0xe5   :  { %v105_v11 = vpop.f32.mrb[0].mxu0 }
  0xe6   :  { %v106_v12 = vadd.f32 %v274_v10, %v105_v11  ;;  %v311_v13 = vpop.f32.mrb[1].mxu0 }
  0xe7   :  { %v108_v14 = vpop.f32.mrb[2].mxu0 }
  0xe8   :  { %vm111_vm2 = vcmp.gt.f32.partialorder %v106_v12, 0.0  ;;  %v112_v15 = vmul.f32 0.01, %v106_v12  ;;  %v312_v16 = vpop.f32.mrb[3].mxu0 }
  0xea   :  { %v113_v17 = vsel %vm111_vm2, %v106_v12, %v112_v15 }
  0xeb   :  { %v114_v18 = vpack.c.bf16 %v113_v17, %v113_v17 }
  0xed   :  { %322 = vmatmul.mubr.msk.bf16.vlgmr.msra.gmra.mrb[0].mxu1 %vm67_vm1, %v114_v18 }
 0x1c0   :  { %v191_v21 = vpop.f32.mrb[0].mxu1 }
 0x1c1   :  { %v192_v22 = vadd.f32 %v280_v20, %v191_v21  ;;  %v323_v23 = vpop.f32.mrb[1].mxu1 }
 0x1c2   :  { %v194_v24 = vpop.f32.mrb[2].mxu1 }
 0x1c3   :  { %vm197_vm3 = vcmp.gt.f32.partialorder %v192_v22, 0.0  ;;  %v198_v25 = vmul.f32 0.01, %v192_v22  ;;  %v324_v26 = vpop.f32.mrb[3].mxu1 }
 0x1c5   :  { %v199_v27 = vsel %vm197_vm3, %v192_v22, %v198_v25 }
 0x1c6   :  { %v200_v28 = vpack.c.bf16 %v199_v27, %v199_v27 }
 0x1c8   :  { %328 = vmatmul.mubr.msk.bf16.vlgmr.msra.gmra.mrb[4].mxu0 %vm216_vm4, %v200_v28 }
 0x29b   :  { %v254_v30 = vpop.f32.mrb[4].mxu0 }
 0x29c   :  { %v255_v31 = vadd.f32 %v286_v29, %v254_v30  ;;  %v329_v32 = vpop.f32.mrb[5].mxu0 }
 0x29d   :  { %v257_v33 = vpop.f32.mrb[6].mxu0 }
 0x29e   :  { %260 = vmax.xlane.f32.xlu0 %v255_v31  ;;  %v330_v34 = vpop.f32.mrb[7].mxu0 }
 0x32b   :  { %v261_v35 = vpop.xlane.xlu0 %260 }
 0x32c   :  { %v262_v36 = vsub.f32 %v255_v31, %v261_v35 }
 0x32e   :  { %v263_v37 = vmul.f32 1.442695, %v262_v36 }
 0x330   :  { %342 = vpow2.f32 %v263_v37 }
 0x33a   :  { %v343_v38 = vpop.eup %342 }
 0x33b   :  { %265 = vadd.xlane.f32.xlu0 %v343_v38 }
 0x3c8   :  { %v266_v39 = vpop.xlane.xlu0 %265 }
 0x3c9   :  { %344 = vrcp.f32 %v266_v39 }
 0x3d3   :  { %v345_v40 = vpop.eup %344 }
 0x3d4   :  { %v268_v41 = vmul.f32 %v345_v40, %v343_v38 }
 0x3d6   :  { %269 = vst [vmem:[%s442_s7] sm:$0xff] %v268_v41 }

</bundles_post_ra>
